<compile_context>
chip_gen: v7x
topology: tpu7x:2x2x1
jax: 0.10.0
libtpu: 0.0.40
codegen_flags: <defaults>
</compile_context>

<pallas_src>
import functools

import jax
import jax.numpy as jnp
from jax.experimental import pallas as pl
from jax.experimental.pallas import tpu as pltpu

ALPHA = 0.3


def _cdiv(a, b):
    return (a + b - 1) // b


def _round_up(x, m):
    return _cdiv(x, m) * m


def _contrast_tile_kernel(tok_r_ref, tok_c_ref, lab_c_ref, lab_r_ref,
                          out_ref, acc_ref, *, alpha):
    j = pl.program_id(1)

    @pl.when(j == 0)
    def _():
        acc_ref[...] = jnp.zeros_like(acc_ref)

    # (TM, L) x (TN, L) contracting the last dims: MXU matmul, bf16 operands,
    # f32 accumulation; the RHS tile transpose rides the otherwise-idle XLU.
    sim = jax.lax.dot_general(
        tok_r_ref[...], tok_c_ref[...],
        dimension_numbers=(((1,), (1,)), ((), ())),
        preferred_element_type=jnp.float32)                      # (TM, TN) f32

    # Binary labels: labels[i] + labels[j] != 1  <=>  labels equal.
    same = lab_c_ref[...] == lab_r_ref[...]                      # (TM, TN) bool
    loss = jnp.where(same, 1.0 - sim, jnp.maximum(sim - alpha, 0.0))

    # Sublane reduce per step (XLU) + one lane-dense (1, TN) accumulate;
    # keeps the vst slot nearly free in the hot loop.
    acc_ref[...] += jnp.sum(loss, axis=0, keepdims=True)

    @pl.when(j == pl.num_programs(1) - 1)
    def _():
        out_ref[0] = acc_ref[...]


def _pick_tiles(n, block_m, block_n):
    # Row tiles: bf16 row operand -> sublane count multiple of 16.
    gi = _cdiv(n, block_m)
    if gi < 2 and n >= 256:
        gi = 2          # keep both v7x TensorCores fed via the parallel axis
    tm = _round_up(_cdiv(n, gi), 16)
    # Column tiles: lane axis multiple of 128.
    gj = _cdiv(n, block_n)
    tn = _round_up(_cdiv(n, gj), 128)
    return tm, gi, tn, gj


def _dense_loss(tokens, labels, alpha=ALPHA):
    """Pure fused-XLA path (small-N fast path and numerical reference)."""
    t = tokens.astype(jnp.float32)
    t = t * jax.lax.rsqrt(jnp.sum(t * t, axis=-1, keepdims=True))
    sim = t @ t.T
    lm = labels[:, None] + labels[None, :]
    loss = jnp.where(lm != 1, 1.0 - sim, jnp.maximum(sim - alpha, 0.0))
    return jnp.mean(loss)


def binary_token_contrast_loss(tokens, labels, alpha=ALPHA,
                               block_m=512, block_n=256, min_kernel_n=512):
    """tokens: (N, L) float; labels: (N,) binary {0, 1}.

    block_m=512 targets the v6e/v7x HBM ridge; pass block_m=256 on v5e.
    Tolerance note: bf16 MXU operands give |sim| errors of order 1e-3..1e-2,
    acceptable for a loss but looser than the f32 reference.
    """
    assert tokens.ndim == 2
    assert tokens.shape[0] == labels.shape[0]
    n, l_dim = tokens.shape

    if n < min_kernel_n:
        # Fixed per-grid-step (~0.35 us) + launch overhead dominates small N.
        return _dense_loss(tokens, labels, alpha)

    # --- hoisted normalization (rsqrt * mul once; MXU operands go bf16) -----
    # TODO(synk): zero-norm rows give NaN, matching the reference semantics.
    t = tokens.astype(jnp.float32)
    inv_norm = jax.lax.rsqrt(jnp.sum(t * t, axis=-1, keepdims=True))
    t_norm = (t * inv_norm).astype(jnp.bfloat16)

    tm, gi, tn, gj = _pick_tiles(n, block_m, block_n)
    n_pad_m = gi * tm
    n_pad_n = gj * tn
    n_pad = max(n_pad_m, n_pad_n)

    # One padded operand feeds both the row and the column streams.
    # Invariant relied on by the analytic padding correction below:
    # padded token rows are exactly zero and padded labels are exactly zero.
    tok = jnp.pad(t_norm, ((0, n_pad - n), (0, 0)))                   # (Np, L)
    lab = labels.astype(jnp.int32)
    lab_col = jnp.pad(lab.reshape(n, 1), ((0, n_pad_m - n), (0, 0)))  # (Nm, 1)
    lab_row = jnp.pad(lab.reshape(1, n), ((0, 0), (0, n_pad_n - n)))  # (1, Nn)

    kernel = functools.partial(_contrast_tile_kernel, alpha=float(alpha))

    # Column stream: triple-buffer only when the per-step DMA is large.
    if l_dim >= 2048:
        col_spec = pl.BlockSpec((tn, l_dim), lambda i, j: (j, 0),
                                pipeline_mode=pl.Buffered(3))
        col_bufs = 3
    else:
        col_spec = pl.BlockSpec((tn, l_dim), lambda i, j: (j, 0))
        col_bufs = 2

    # VMEM budget: buffered token tiles + f32 temporaries + scratch,
    # capped at 32 MiB (safe on v7x's 64 MiB physical VMEM).
    vmem_bytes = (2 * tm * l_dim * 2              # row token tiles (bf16, 2 bufs)
                  + col_bufs * tn * l_dim * 2     # col token tiles
                  + 2 * (tm + tn) * 4             # label tiles
                  + 2 * tm * tn * 4               # sim / loss f32 temporaries
                  + 3 * tn * 4)                   # acc scratch + output block
    vmem_limit = int(min(max(2 * vmem_bytes, 16 * 1024 * 1024),
                         32 * 1024 * 1024))

    cost = pl.CostEstimate(
        flops=2 * n_pad_m * n_pad_n * l_dim,
        transcendentals=0,
        bytes_accessed=(n_pad_m * l_dim * 2           # row operand, one sweep
                        + gi * n_pad_n * l_dim * 2    # col operand per row tile
                        + (n_pad_m + n_pad_n) * 4     # labels
                        + gi * tn * 4))               # partial outputs

    partials = pl.pallas_call(
        kernel,
        out_shape=jax.ShapeDtypeStruct((gi, 1, tn), jnp.float32),
        grid_spec=pltpu.PrefetchScalarGridSpec(
            num_scalar_prefetch=0,
            grid=(gi, gj),
            in_specs=[
                pl.BlockSpec((tm, l_dim), lambda i, j: (i, 0)),   # row tokens
                col_spec,                                         # col tokens
                pl.BlockSpec((tm, 1), lambda i, j: (i, 0)),       # labels (col vec)
                pl.BlockSpec((1, tn), lambda i, j: (0, j)),       # labels (row vec)
            ],
            out_specs=pl.BlockSpec((1, 1, tn), lambda i, j: (i, 0, 0)),
            scratch_shapes=[pltpu.VMEM((1, tn), jnp.float32)],
        ),
        compiler_params=pltpu.CompilerParams(
            dimension_semantics=("parallel", "arbitrary"),
            vmem_limit_bytes=vmem_limit,
        ),
        cost_estimate=cost,
    )(tok, tok, lab_col, lab_row)

    total = jnp.sum(partials)

    # Analytic padding correction (replaces the old per-tile iota mask):
    # a padded pair has sim == 0 and label 0, so it contributes exactly 1 when
    # the other label is 0 (or both sides are padded) and exactly 0 otherwise.
    pm = n_pad_m - n
    pn = n_pad_n - n
    if pm or pn:
        zeros = jnp.float32(n) - jnp.sum(lab).astype(jnp.float32)
        total = total - (jnp.float32(pm + pn) * zeros + jnp.float32(pm * pn))

    return total * jnp.float32(1.0 / (n * n))


if __name__ == "__main__":
    key = jax.random.PRNGKey(0)
    k_tok, k_lab, k_tok2, k_lab2 = jax.random.split(key, 4)

    # Small shape consistent with the module's forward: N tokens of hidden L.
    # Force the Pallas kernel path (default would take the small-N fast path).
    N, L = 8, 32
    tokens = jax.random.normal(k_tok, (N, L), dtype=jnp.float32)
    labels = jax.random.bernoulli(k_lab, 0.5, (N,)).astype(jnp.int32)
    loss = jax.block_until_ready(
        binary_token_contrast_loss(tokens, labels, min_kernel_n=0))
    ref = _dense_loss(tokens, labels)
    # bf16 MXU operands => relaxed tolerance vs. the f32 reference.
    assert jnp.allclose(loss, ref, atol=2e-2, rtol=2e-2), (loss, ref)

    # Multi-tile path with padding (gi=2, gj=2) and analytic correction.
    N2, L2 = 300, 64
    tokens2 = jax.random.normal(k_tok2, (N2, L2), dtype=jnp.float32)
    labels2 = jax.random.bernoulli(k_lab2, 0.5, (N2,)).astype(jnp.int32)
    loss2 = jax.block_until_ready(
        binary_token_contrast_loss(tokens2, labels2, min_kernel_n=0))
    ref2 = _dense_loss(tokens2, labels2)
    assert jnp.allclose(loss2, ref2, atol=2e-2, rtol=2e-2), (loss2, ref2)

    # Default entry point: small-N fused-XLA fast path (exact vs. reference).
    loss3 = jax.block_until_ready(binary_token_contrast_loss(tokens, labels))
    assert jnp.allclose(loss3, ref, atol=1e-5, rtol=1e-5), (loss3, ref)

    print("KERNEL_OK")
</pallas_src>

<mosaic_0001>
module attributes {stable_mosaic.version = 11 : i64} {
  func.func @_contrast_tile_kernel(%arg0: i32, %arg1: i32, %arg2: memref<16x32xbf16, #tpu.memory_space<vmem>>, %arg3: memref<128x32xbf16, #tpu.memory_space<vmem>>, %arg4: memref<16x1xi32, #tpu.memory_space<vmem>>, %arg5: memref<1x128xi32, #tpu.memory_space<vmem>>, %arg6: memref<1x1x128xf32, #tpu.memory_space<vmem>>, %arg7: memref<1x128xf32, #tpu.memory_space<vmem>>) attributes {dimension_semantics = [#tpu.dimension_semantics<parallel>, #tpu.dimension_semantics<arbitrary>], iteration_bounds = array<i64: 1, 1>, scalar_prefetch = 0 : i64, scratch_operands = 1 : i64, tpu.core_type = #tpu.core_type<tc>, window_params = [{transform_indices = @transform_0, window_bounds = array<i64: 16, 32>}, {transform_indices = @transform_1, window_bounds = array<i64: 128, 32>}, {transform_indices = @transform_2, window_bounds = array<i64: 16, 1>}, {transform_indices = @transform_3, window_bounds = array<i64: 1, 128>}, {transform_indices = @transform_4, window_bounds = array<i64: 1, 1, 128>}]} {
    %c0_i32 = arith.constant 0 : i32
    %0 = arith.cmpi eq, %arg1, %c0_i32 : i32
    %1 = arith.extui %0 : i1 to i32
    %c0_i32_0 = arith.constant 0 : i32
    %2 = arith.cmpi ne, %1, %c0_i32_0 : i32
    scf.if %2 {
      %cst_18 = arith.constant 0.000000e+00 : f32
      %26 = vector.broadcast %cst_18 : f32 to vector<1x128xf32>
      %c0_19 = arith.constant 0 : index
      %c0_20 = arith.constant 0 : index
      %27 = vector.load %arg7[%c0_19, %c0_20] : memref<1x128xf32, #tpu.memory_space<vmem>>, vector<1x128xf32>
      tpu.vector_store %arg7[%c0_19, %c0_20], %26 {strides = array<i32>} : memref<1x128xf32, #tpu.memory_space<vmem>>, vector<1x128xf32>,
    } else {
    }
    %c0 = arith.constant 0 : index
    %c0_1 = arith.constant 0 : index
    %3 = vector.load %arg2[%c0, %c0_1] : memref<16x32xbf16, #tpu.memory_space<vmem>>, vector<16x32xbf16>
    %c0_2 = arith.constant 0 : index
    %c0_3 = arith.constant 0 : index
    %4 = vector.load %arg3[%c0_2, %c0_3] : memref<128x32xbf16, #tpu.memory_space<vmem>>, vector<128x32xbf16>
    %cst = arith.constant dense<0.000000e+00> : vector<16x128xf32>
    %5 = tpu.matmul %3, %4, %cst {dimension_numbers = #tpu.dot_dimension_numbers<[1], [1], [0], [0], [0, 0, 1, 0], [], []>} : vector<16x32xbf16>, vector<128x32xbf16>, vector<16x128xf32> -> vector<16x128xf32>
    %c0_4 = arith.constant 0 : index
    %c0_5 = arith.constant 0 : index
    %6 = vector.load %arg4[%c0_4, %c0_5] : memref<16x1xi32, #tpu.memory_space<vmem>>, vector<16x1xi32>
    %c0_6 = arith.constant 0 : index
    %c0_7 = arith.constant 0 : index
    %7 = vector.load %arg5[%c0_6, %c0_7] : memref<1x128xi32, #tpu.memory_space<vmem>>, vector<1x128xi32>
    %8 = vector.broadcast %6 : vector<16x1xi32> to vector<16x128xi32>
    %9 = vector.broadcast %7 : vector<1x128xi32> to vector<16x128xi32>
    %10 = arith.cmpi eq, %8, %9 : vector<16x128xi32>
    %cst_8 = arith.constant 1.000000e+00 : f32
    %11 = vector.broadcast %cst_8 : f32 to vector<16x128xf32>
    %12 = arith.subf %11, %5 : vector<16x128xf32>
    %cst_9 = arith.constant 3.000000e-01 : f32
    %13 = vector.broadcast %cst_9 : f32 to vector<16x128xf32>
    %14 = arith.subf %5, %13 : vector<16x128xf32>
    %cst_10 = arith.constant 0.000000e+00 : f32
    %15 = vector.broadcast %cst_10 : f32 to vector<16x128xf32>
    %16 = arith.maximumf %14, %15 : vector<16x128xf32>
    %17 = arith.select %10, %12, %16 : vector<16x128xi1>, vector<16x128xf32>
    %c0_11 = arith.constant 0 : index
    %c0_12 = arith.constant 0 : index
    %18 = vector.load %arg7[%c0_11, %c0_12] : memref<1x128xf32, #tpu.memory_space<vmem>>, vector<1x128xf32>
    %cst_13 = arith.constant dense<0.000000e+00> : vector<128xf32>
    %19 = vector.multi_reduction <add>, %17, %cst_13 [0] : vector<16x128xf32> to vector<128xf32>
    %20 = vector.shape_cast %19 : vector<128xf32> to vector<1x128xf32>
    %21 = arith.addf %18, %20 : vector<1x128xf32>
    %c0_14 = arith.constant 0 : index
    %c0_15 = arith.constant 0 : index
    %22 = vector.load %arg7[%c0_14, %c0_15] : memref<1x128xf32, #tpu.memory_space<vmem>>, vector<1x128xf32>
    tpu.vector_store %arg7[%c0_14, %c0_15], %21 {strides = array<i32>} : memref<1x128xf32, #tpu.memory_space<vmem>>, vector<1x128xf32>,
    %c0_i32_16 = arith.constant 0 : i32
    %23 = arith.cmpi eq, %arg1, %c0_i32_16 : i32
    %24 = arith.extui %23 : i1 to i32
    %c0_i32_17 = arith.constant 0 : i32
    %25 = arith.cmpi ne, %24, %c0_i32_17 : i32
    scf.if %25 {
      %c0_18 = arith.constant 0 : index
      %c0_19 = arith.constant 0 : index
      %26 = vector.load %arg7[%c0_18, %c0_19] : memref<1x128xf32, #tpu.memory_space<vmem>>, vector<1x128xf32>
      %c0_20 = arith.constant 0 : index
      %c0_21 = arith.constant 0 : index
      %c0_22 = arith.constant 0 : index
      %27 = vector.load %arg6[%c0_20, %c0_21, %c0_22] : memref<1x1x128xf32, #tpu.memory_space<vmem>>, vector<1x1x128xf32>
      %28 = vector.shape_cast %27 : vector<1x1x128xf32> to vector<1x128xf32>
      %29 = vector.shape_cast %26 : vector<1x128xf32> to vector<1x1x128xf32>
      tpu.vector_store %arg6[%c0_20, %c0_21, %c0_22], %29 {strides = array<i32>} : memref<1x1x128xf32, #tpu.memory_space<vmem>>, vector<1x1x128xf32>,
    } else {
    }
    return
  }
  func.func @transform_0(%arg0: i32, %arg1: i32) -> (i32, i32) {
    %c0_i32 = arith.constant 0 : i32
    %c0_i32_0 = arith.constant 0 : i32
    return %arg0, %c0_i32 : i32, i32
  }
  func.func @transform_1(%arg0: i32, %arg1: i32) -> (i32, i32) {
    %c0_i32 = arith.constant 0 : i32
    %c0_i32_0 = arith.constant 0 : i32
    return %arg1, %c0_i32 : i32, i32
  }
  func.func @transform_2(%arg0: i32, %arg1: i32) -> (i32, i32) {
    %c0_i32 = arith.constant 0 : i32
    %c0_i32_0 = arith.constant 0 : i32
    return %arg0, %c0_i32 : i32, i32
  }
  func.func @transform_3(%arg0: i32, %arg1: i32) -> (i32, i32) {
    %c0_i32 = arith.constant 0 : i32
    %c0_i32_0 = arith.constant 0 : i32
    return %c0_i32, %arg1 : i32, i32
  }
  func.func @transform_4(%arg0: i32, %arg1: i32) -> (i32, i32, i32) {
    %c0_i32 = arith.constant 0 : i32
    %c0_i32_0 = arith.constant 0 : i32
    %c0_i32_1 = arith.constant 0 : i32
    return %arg0, %c0_i32, %c0_i32_0 : i32, i32, i32
  }
}

</mosaic_0001>

<bundles_post_ra>
// kernel: tpu_custom_call.1
= control target key start
LH: loop header
LB: loop body
LE: loop exit
PB: predicated region body
PF: predicated region fallthrough
CT: control target
= control target key end

     0   :  { %v288_v1 = vmov 0.0   ;;  %vm87_vm0 = vcmask 261120   ;;  %vm289_vm1 = vmmov 0   ;;  %v290_v6 = vmov 0   ;;  %s374_s0 = inlined_call_operand.vmem [shape: bf16[128,32], index: 0, kind: input, shape index: {}]   ;;  %s375_s1 = inlined_call_operand.vmem [shape: bf16[128,32], index: 1, kind: input, shape index: {}]   ;;  %s376_s2 = inlined_call_operand.vmem [shape: s32[16,1], index: 2, kind: input, shape index: {}]   ;;  %s377_s3 = inlined_call_operand.vmem [shape: s32[1,128], index: 3, kind: input, shape index: {}]   ;;  %s378_s4 = inlined_call_operand.hbm [shape: f32[1,1,128], index: 4, kind: output, shape index: {}]  }
   0x1   :  { %v255_v0 = vld [vmem:[%s375_s1] sm:$0xff]   ;;  %230 = vmatprep.subr.bf16.mxu0 %v288_v1  ;;  %23 = vst [vmem:[#allocation2] sm:$0x1] %v288_v1  ;;  %v256_v3 = vld [vmem:[%s375_s1 + $0x8] sm:$0xff]   ;;  %246 = vmatprep.mubr.msk.bf16.mxu0 %vm289_vm1, %v288_v1 }
   0x2   :  { %v92_v2 = vsel %vm87_vm0, %v255_v0, 0  ;;  %v95_v4 = vsel %vm87_vm0, %v256_v3, 0  ;;  %v156_v5 = vld [vmem:[%s376_s2] sm:$0xff]  ;;  %254 = vset.pattern.permute.xlu0 %v290_v6 }
   0x3   :  { %231 = vmatpush3.bf16.xpose.msra.mxu0 %v92_v2 }
   0x4   :  { %232 = vmatprep.subr.bf16.mxu0 %v288_v1 }
   0x5   :  { %9 = vsyncpa [#allocation4], 0  ;;  %160 = vperm.xlu0 %254, %v156_v5   ;;  %v257_v7 = vld [vmem:[%s375_s1 + $0x10] sm:$0xff]   ;;  %v157_v8 = vld [vmem:[%s376_s2 + $0x8] sm:$0xff] }
   0x6   :  { %v98_v9 = vsel %vm87_vm0, %v257_v7, 0  ;;  %v258_v10 = vld [vmem:[%s375_s1 + $0x18] sm:$0xff]   ;;  %v259_v12 = vld [vmem:[%s375_s1 + $0x20] sm:$0xff]   ;;  %v260_v14 = vld [vmem:[%s375_s1 + $0x28] sm:$0xff]  }
   0x7   :  { %v101_v11 = vsel %vm87_vm0, %v258_v10, 0  ;;  %v104_v13 = vsel %vm87_vm0, %v259_v12, 0  ;;  %v107_v15 = vsel %vm87_vm0, %v260_v14, 0  ;;  %v261_v16 = vld [vmem:[%s375_s1 + $0x30] sm:$0xff]   ;;  %v262_v18 = vld [vmem:[%s375_s1 + $0x38] sm:$0xff]   ;;  %v263_v20 = vld [vmem:[%s374_s0] sm:$0xff]  }
   0x8   :  { %v110_v17 = vsel %vm87_vm0, %v261_v16, 0  ;;  %v113_v19 = vsel %vm87_vm0, %v262_v18, 0  ;;  %v218_v26 = vld [vmem:[%s377_s3] ss:$0 sm:$0xff]  ;;  %s291_s0 = smov [#allocation3]  }
   0x9   :  { %163 = vperm.xlu0 %254, %v157_v8   ;;  %v179_v42 = vld [vmem:[#allocation2] sm:$0x1]  ;;  %s200_s1 = sshll.u32 %s291_s0, 4  ;;  %s201_s1 = int_to_ptr.vmem [resolvable:$true] %s200_s1 }
   0xa   :  { %s264_s3 = scalar_lea.vmem %s201_s1, 16  ;;  %s268_s12 = scalar_lea.vmem %s201_s1, 32 }
   0xb   :  { %233 = vmatpush3.bf16.xpose.msra.mxu0 %v95_v4  ;;  %p265_p0 = scmp.ne.s32.totalorder %s201_s1, %s264_s3  ;;  %p269_p1 = scmp.lt.s32.totalorder %s201_s1, %s201_s1 }
   0xc   :  { %234 = vmatprep.subr.bf16.mxu0 %v288_v1  ;;  %p270_p2 = scmp.lt.s32.totalorder %s268_s12, %s264_s3 }
   0xe   :  { %p271_p3 = por %p270_p2, %p269_p1 }
  0x10   :  { %p272_p4 = pnand %p271_p3, %p265_p0 }
  0x13   :  { %235 = vmatpush3.bf16.xpose.msra.mxu0 %v98_v9 }
  0x14   :  { %236 = vmatprep.subr.bf16.mxu0 %v288_v1 }
  0x1b   :  { %237 = vmatpush3.bf16.xpose.msra.mxu0 %v101_v11 }
  0x1c   :  { %238 = vmatprep.subr.bf16.mxu0 %v288_v1 }
  0x23   :  { %239 = vmatpush3.bf16.xpose.msra.mxu0 %v104_v13 }
  0x24   :  { %240 = vmatprep.subr.bf16.mxu0 %v288_v1 }
  0x2b   :  { %241 = vmatpush3.bf16.xpose.msra.mxu0 %v107_v15 }
  0x2c   :  { %242 = vmatprep.subr.bf16.mxu0 %v288_v1 }
  0x33   :  { %243 = vmatpush3.bf16.xpose.msra.mxu0 %v110_v17 }
  0x34   :  { %244 = vmatprep.subr.bf16.mxu0 %v288_v1 }
  0x3b   :  { %245 = vmatpush3.bf16.xpose.msra.mxu0 %v113_v19 }
  0x42   :  { %247 = vmatmul.mubr.msk.bf16.vlgmr.msra.gmra.mrb[0].mxu0 %vm87_vm0, %v263_v20 }
  0x84   :  { %v161_v21 = vpop.permute.xlu0 %160 }
  0x85   :  { %vm169_vm2 = vcmp.eq.s32.totalorder %v161_v21, %v218_v26 }
  0x88   :  { %v164_v28 = vpop.permute.xlu0 %163 }
  0x89   :  { %vm170_vm3 = vcmp.eq.s32.totalorder %v164_v28, %v218_v26 }
 0x115   :  { %v149_v22 = vpop.f32.mrb[0].mxu0 }
 0x116   :  { %v219_v23 = vadd.f32 -0.3, %v149_v22  ;;  %v248_v24 = vpop.f32.mrb[1].mxu0  ;;  %v171_v31 = vsub.f32 1.0, %v149_v22 }
 0x117   :  { %v152_v25 = vpop.f32.mrb[2].mxu0 }
 0x118   :  { %v175_v27 = vmax.f32 %v219_v23, 0.0  ;;  %v220_v29 = vadd.f32 -0.3, %v152_v25  ;;  %v249_v30 = vpop.f32.mrb[3].mxu0  ;;  %v172_v32 = vsub.f32 1.0, %v152_v25 }
 0x11a   :  { %v176_v33 = vmax.f32 %v220_v29, 0.0  ;;  %v177_v34 = vsel %vm169_vm2, %v171_v31, %v175_v27 }
 0x11c   :  { %v178_v35 = vsel %vm170_vm3, %v172_v32, %v176_v33 }
 0x11d   :  { %v180_v36 = vadd.f32 %v178_v35, %v177_v34 }
 0x11f   :  { %v181_v37 = vrot.slane %v180_v36, 4 }
 0x121   :  { %v182_v38 = vadd.f32 %v181_v37, %v180_v36 }
 0x123   :  { %v183_v39 = vrot.slane %v182_v38, 2 }
 0x125   :  { %v184_v40 = vadd.f32 %v183_v39, %v182_v38 }
 0x127   :  { %v185_v41 = vrot.slane %v184_v40, 1 }
 0x129   :  { %v186_v43 = vadd.f32 %v185_v41, %v184_v40 }
 0x12b   :  { %v187_v44 = vadd.f32 %v186_v43, %v179_v42 }
 0x12d   :  { %188 = vst [vmem:[#allocation2] sm:$0x1] %v187_v44 }
 0x134   :  { %v192_v45 = vld [vmem:[#allocation2] sm:$0x1] }
 0x135   :  { %193 = vst [vmem:[#allocation3] sm:$0x1] %v192_v45 }
 0x136   :  { %275 = shalt.err (!%p272_p4)
}
 0x137   :  { %s276_s15 = scalar_lea.hbm %s378_s4, 16 }
 0x138   :  { %p277_p5 = scmp.ne.s32.totalorder %s378_s4, %s276_s15  ;;  %p280_p6 = scmp.lt.u32.totalorder %s276_s15, %s378_s4 }
 0x13a   :  { %p282_p7 = pnand %p280_p6, %p277_p5 }
 0x13c   :  { %285 = shalt.err (!%p282_p7)
}
 0x13d   :  { %203 = dma.vmem_to_hbm [thread:$0]  %s201_s1, 16, %s378_s4, [#allocation4]  }
 0x13e   :  { %286 = dma.done.wait [#allocation4], 16  }
 0x13f   :  { %287 = vsyncadd [#allocation4], 4294967280 }
 0x140   :  { %207 = vsyncpa [#allocation4], 1 }

</bundles_post_ra>
